<compile_context>
chip_gen: v7x
topology: tpu7x:2x2x1
jax: 0.10.0
libtpu: 0.0.40
codegen_flags: <defaults>
</compile_context>

<pallas_src>
import math
import functools

import jax
import jax.numpy as jnp
from jax import lax
from jax.experimental import pallas as pl
from jax.experimental.pallas import tpu as pltpu

_MAX_ROWS = 256  # sublane rows per grid step -> 256*128 = 32768 boxes per step.
                 # Per-input block = 4*256*128*4 B = 512 KiB; double-buffered for
                 # two box inputs (+weight) stays far under VMEM limits on
                 # v5e/v6e (128 MiB) and v7x (64 MiB physical / 32 MiB scoped).


def _round_up(x, m):
    return ((x + m - 1) // m) * m


def _per_box_losses(loss_type, p_l, p_t, p_r, p_b, t_l, t_t, t_r, t_b):
    """Elementwise IOU-family loss. All args are identically-shaped f32 arrays."""
    target_area = (t_l + t_r) * (t_t + t_b)
    pred_area = (p_l + p_r) * (p_t + p_b)
    w_intersect = jnp.minimum(p_l, t_l) + jnp.minimum(p_r, t_r)
    h_intersect = jnp.minimum(p_b, t_b) + jnp.minimum(p_t, t_t)
    area_intersect = w_intersect * h_intersect
    area_union = target_area + pred_area - area_intersect
    ious = (area_intersect + 1.0) / (area_union + 1.0)

    if loss_type == "iou":
        return 1.0 - ious
    if loss_type == "log_iou":
        return -jnp.log(ious)

    g_w_intersect = jnp.maximum(p_l, t_l) + jnp.maximum(p_r, t_r)
    g_h_intersect = jnp.maximum(p_b, t_b) + jnp.maximum(p_t, t_t)

    if loss_type == "giou":
        ac_union = g_w_intersect * g_h_intersect + 1e-07
        gious = ious - (ac_union - area_union) / ac_union
        return 1.0 - gious

    cen_dx = t_r - t_l - p_r + p_l
    cen_dy = t_b - t_t - p_b + p_t
    inter_diag = cen_dx ** 2 + cen_dy ** 2
    outer_diag = g_h_intersect ** 2 + g_w_intersect ** 2
    # TODO(synk): matches the PyTorch reference exactly; fully-degenerate boxes
    # (all offsets 0) give 0/0 NaN in both implementations.
    r_dious = inter_diag / outer_diag

    if loss_type == "diou":
        dious = jnp.clip(ious - r_dious, -1.0, 1.0)
        return 1.0 - dious

    if loss_type == "ciou":
        w2 = t_l + t_r
        h2 = t_t + t_b
        w1 = p_l + p_r
        h1 = p_t + p_b
        v = (4.0 / math.pi ** 2) * (jnp.arctan(w2 / h2) - jnp.arctan(w1 / h1)) ** 2
        alpha = v / (1.0 - ious + v)
        cious = jnp.clip(ious - r_dious - alpha * v, -1.0, 1.0)
        return 1.0 - cious

    raise NotImplementedError(loss_type)


def _partial_sum_8x128(x, rows):
    # (rows, 128) -> (8, 128): groups of aligned (8,128) tiles, plain VPU adds.
    return jnp.sum(x.reshape(rows // 8, 8, 128), axis=0)


def _valid_mask(n_ref, rows):
    row = lax.broadcasted_iota(jnp.int32, (rows, 128), 0)
    lane = lax.broadcasted_iota(jnp.int32, (rows, 128), 1)
    gidx = (pl.program_id(0) * rows + row) * 128 + lane
    return gidx < n_ref[0]


def _iou_loss_kernel_unweighted(n_ref, pred_ref, target_ref, loss_out,
                                *, loss_type, rows):
    losses = _per_box_losses(
        loss_type,
        pred_ref[0], pred_ref[1], pred_ref[2], pred_ref[3],
        target_ref[0], target_ref[1], target_ref[2], target_ref[3])
    losses = jnp.where(_valid_mask(n_ref, rows), losses, 0.0)
    loss_out[0] = _partial_sum_8x128(losses, rows)


def _iou_loss_kernel_weighted(n_ref, pred_ref, target_ref, w_ref,
                              loss_out, wloss_out, w_out, *, loss_type, rows):
    losses = _per_box_losses(
        loss_type,
        pred_ref[0], pred_ref[1], pred_ref[2], pred_ref[3],
        target_ref[0], target_ref[1], target_ref[2], target_ref[3])
    losses = jnp.where(_valid_mask(n_ref, rows), losses, 0.0)
    w = w_ref[...]  # zero-padded by the wrapper, no extra masking needed
    loss_out[0] = _partial_sum_8x128(losses, rows)
    wloss_out[0] = _partial_sum_8x128(losses * w, rows)
    w_out[0] = _partial_sum_8x128(w, rows)


def iou_loss(pred, target, weight=None, loss_type="iou"):
    """Pallas implementation of IOULoss(loss_type).forward(pred, target, weight)."""
    n = pred.shape[0]
    assert pred.shape == (n, 4) and target.shape == (n, 4) and n > 0

    n_rows = pl.cdiv(n, 128)                       # number of 128-lane rows
    rows = min(_MAX_ROWS, _round_up(n_rows, 8))    # sublane rows per grid step
    grid = pl.cdiv(n_rows, rows)
    n_pad = grid * rows * 128

    def pack_boxes(x):
        xt = x.astype(jnp.float32).T                                   # (4, n)
        xt = jnp.pad(xt, ((0, 0), (0, n_pad - n)), constant_values=1.0)
        return xt.reshape(4, grid * rows, 128)

    pred_p = pack_boxes(pred)
    target_p = pack_boxes(target)
    n_arr = jnp.array([n], jnp.int32)

    box_spec = pl.BlockSpec((4, rows, 128), lambda i, n_s: (0, i, 0))
    out_spec = pl.BlockSpec((1, 8, 128), lambda i, n_s: (i, 0, 0))
    out_shape = jax.ShapeDtypeStruct((grid, 8, 128), jnp.float32)
    cparams = pltpu.CompilerParams(dimension_semantics=("parallel",))

    if weight is None:
        kernel = functools.partial(_iou_loss_kernel_unweighted,
                                   loss_type=loss_type, rows=rows)
        partials = pl.pallas_call(
            kernel,
            out_shape=out_shape,
            grid_spec=pltpu.PrefetchScalarGridSpec(
                num_scalar_prefetch=1,
                grid=(grid,),
                in_specs=[box_spec, box_spec],
                out_specs=out_spec),
            compiler_params=cparams,
        )(n_arr, pred_p, target_p)
        return jnp.sum(partials)

    w_p = jnp.pad(weight.astype(jnp.float32), (0, n_pad - n))
    w_p = w_p.reshape(grid * rows, 128)
    kernel = functools.partial(_iou_loss_kernel_weighted,
                               loss_type=loss_type, rows=rows)
    loss_part, wloss_part, w_part = pl.pallas_call(
        kernel,
        out_shape=(out_shape, out_shape, out_shape),
        grid_spec=pltpu.PrefetchScalarGridSpec(
            num_scalar_prefetch=1,
            grid=(grid,),
            in_specs=[box_spec, box_spec,
                      pl.BlockSpec((rows, 128), lambda i, n_s: (i, 0))],
            out_specs=[out_spec, out_spec, out_spec]),
        compiler_params=cparams,
    )(n_arr, pred_p, target_p, w_p)

    loss_sum = jnp.sum(loss_part)
    wloss_sum = jnp.sum(wloss_part)
    w_sum = jnp.sum(w_part)
    # PyTorch: weight.sum() > 0 -> (losses*weight).sum()/weight.sum(), else losses.sum().
    denom = jnp.where(w_sum > 0.0, w_sum, 1.0)     # keep untaken branch NaN-free
    return jnp.where(w_sum > 0.0, wloss_sum / denom, loss_sum)


# ------------------------- pure-JAX reference -------------------------------
def _ref_loss(pred, target, weight=None, loss_type="iou"):
    p = pred.astype(jnp.float32)
    t = target.astype(jnp.float32)
    losses = _per_box_losses(loss_type,
                             p[:, 0], p[:, 1], p[:, 2], p[:, 3],
                             t[:, 0], t[:, 1], t[:, 2], t[:, 3])
    if weight is not None:
        w = weight.astype(jnp.float32)
        w_sum = jnp.sum(w)
        safe = jnp.where(w_sum > 0, w_sum, 1.0)
        return jnp.where(w_sum > 0, jnp.sum(losses * w) / safe, jnp.sum(losses))
    return jnp.sum(losses)


if __name__ == "__main__":
    key = jax.random.PRNGKey(0)
    ok = True
    for N in (8, 300):   # small shapes; N=300 exercises in-kernel lane masking
        k1, k2, k3 = jax.random.split(jax.random.fold_in(key, N), 3)
        # l, t, r, b distances are positive by construction in FCOS-style targets.
        pred = jax.random.uniform(k1, (N, 4), jnp.float32, minval=0.1, maxval=2.0)
        target = jax.random.uniform(k2, (N, 4), jnp.float32, minval=0.1, maxval=2.0)
        weight = jax.random.uniform(k3, (N,), jnp.float32, minval=0.0, maxval=1.0)

        for lt in ("iou", "log_iou", "giou", "diou", "ciou"):
            for w in (None, weight):
                out = jax.block_until_ready(iou_loss(pred, target, w, loss_type=lt))
                ref = _ref_loss(pred, target, w, loss_type=lt)
                if not jnp.allclose(out, ref, rtol=1e-4, atol=1e-4):
                    ok = False
                    print(f"MISMATCH N={N} loss_type={lt} weighted={w is not None}: "
                          f"{out} vs {ref}")
    if ok:
        print("KERNEL_OK")
</pallas_src>

<mosaic_0001>
module attributes {stable_mosaic.version = 11 : i64} {
  func.func @_iou_loss_kernel_unweighted(%arg0: i32, %arg1: memref<1xi32, #tpu.memory_space<smem>>, %arg2: memref<4x8x128xf32, #tpu.memory_space<vmem>>, %arg3: memref<4x8x128xf32, #tpu.memory_space<vmem>>, %arg4: memref<1x8x128xf32, #tpu.memory_space<vmem>>) attributes {dimension_semantics = [#tpu.dimension_semantics<parallel>], iteration_bounds = array<i64: 1>, scalar_prefetch = 1 : i64, scratch_operands = 0 : i64, tpu.core_type = #tpu.core_type<tc>, window_params = [{transform_indices = @transform_0, window_bounds = array<i64: 4, 8, 128>}, {transform_indices = @transform_1, window_bounds = array<i64: 4, 8, 128>}, {transform_indices = @transform_2, window_bounds = array<i64: 1, 8, 128>}]} {
    %c0 = arith.constant 0 : index
    %c0_0 = arith.constant 0 : index
    %c0_1 = arith.constant 0 : index
    %0 = vector.load %arg2[%c0, %c0_0, %c0_1] : memref<4x8x128xf32, #tpu.memory_space<vmem>>, vector<1x8x128xf32>
    %1 = vector.shape_cast %0 : vector<1x8x128xf32> to vector<8x128xf32>
    %c1 = arith.constant 1 : index
    %c0_2 = arith.constant 0 : index
    %c0_3 = arith.constant 0 : index
    %2 = vector.load %arg2[%c1, %c0_2, %c0_3] : memref<4x8x128xf32, #tpu.memory_space<vmem>>, vector<1x8x128xf32>
    %3 = vector.shape_cast %2 : vector<1x8x128xf32> to vector<8x128xf32>
    %c2 = arith.constant 2 : index
    %c0_4 = arith.constant 0 : index
    %c0_5 = arith.constant 0 : index
    %4 = vector.load %arg2[%c2, %c0_4, %c0_5] : memref<4x8x128xf32, #tpu.memory_space<vmem>>, vector<1x8x128xf32>
    %5 = vector.shape_cast %4 : vector<1x8x128xf32> to vector<8x128xf32>
    %c3 = arith.constant 3 : index
    %c0_6 = arith.constant 0 : index
    %c0_7 = arith.constant 0 : index
    %6 = vector.load %arg2[%c3, %c0_6, %c0_7] : memref<4x8x128xf32, #tpu.memory_space<vmem>>, vector<1x8x128xf32>
    %7 = vector.shape_cast %6 : vector<1x8x128xf32> to vector<8x128xf32>
    %c0_8 = arith.constant 0 : index
    %c0_9 = arith.constant 0 : index
    %c0_10 = arith.constant 0 : index
    %8 = vector.load %arg3[%c0_8, %c0_9, %c0_10] : memref<4x8x128xf32, #tpu.memory_space<vmem>>, vector<1x8x128xf32>
    %9 = vector.shape_cast %8 : vector<1x8x128xf32> to vector<8x128xf32>
    %c1_11 = arith.constant 1 : index
    %c0_12 = arith.constant 0 : index
    %c0_13 = arith.constant 0 : index
    %10 = vector.load %arg3[%c1_11, %c0_12, %c0_13] : memref<4x8x128xf32, #tpu.memory_space<vmem>>, vector<1x8x128xf32>
    %11 = vector.shape_cast %10 : vector<1x8x128xf32> to vector<8x128xf32>
    %c2_14 = arith.constant 2 : index
    %c0_15 = arith.constant 0 : index
    %c0_16 = arith.constant 0 : index
    %12 = vector.load %arg3[%c2_14, %c0_15, %c0_16] : memref<4x8x128xf32, #tpu.memory_space<vmem>>, vector<1x8x128xf32>
    %13 = vector.shape_cast %12 : vector<1x8x128xf32> to vector<8x128xf32>
    %c3_17 = arith.constant 3 : index
    %c0_18 = arith.constant 0 : index
    %c0_19 = arith.constant 0 : index
    %14 = vector.load %arg3[%c3_17, %c0_18, %c0_19] : memref<4x8x128xf32, #tpu.memory_space<vmem>>, vector<1x8x128xf32>
    %15 = vector.shape_cast %14 : vector<1x8x128xf32> to vector<8x128xf32>
    %16 = arith.addf %9, %13 : vector<8x128xf32>
    %17 = arith.addf %11, %15 : vector<8x128xf32>
    %18 = arith.mulf %16, %17 : vector<8x128xf32>
    %19 = arith.addf %1, %5 : vector<8x128xf32>
    %20 = arith.addf %3, %7 : vector<8x128xf32>
    %21 = arith.mulf %19, %20 : vector<8x128xf32>
    %22 = arith.minimumf %1, %9 : vector<8x128xf32>
    %23 = arith.minimumf %5, %13 : vector<8x128xf32>
    %24 = arith.addf %22, %23 : vector<8x128xf32>
    %25 = arith.minimumf %7, %15 : vector<8x128xf32>
    %26 = arith.minimumf %3, %11 : vector<8x128xf32>
    %27 = arith.addf %25, %26 : vector<8x128xf32>
    %28 = arith.mulf %24, %27 : vector<8x128xf32>
    %29 = arith.addf %18, %21 : vector<8x128xf32>
    %30 = arith.subf %29, %28 : vector<8x128xf32>
    %cst = arith.constant 1.000000e+00 : f32
    %31 = vector.broadcast %cst : f32 to vector<8x128xf32>
    %32 = arith.addf %28, %31 : vector<8x128xf32>
    %cst_20 = arith.constant 1.000000e+00 : f32
    %33 = vector.broadcast %cst_20 : f32 to vector<8x128xf32>
    %34 = arith.addf %30, %33 : vector<8x128xf32>
    %35 = arith.divf %32, %34 : vector<8x128xf32>
    %cst_21 = arith.constant 1.000000e+00 : f32
    %36 = vector.broadcast %cst_21 : f32 to vector<8x128xf32>
    %37 = arith.subf %36, %35 : vector<8x128xf32>
    %38 = tpu.iota {dimensions = array<i32: 0>} : vector<8x128xi32>
    %39 = tpu.iota {dimensions = array<i32: 1>} : vector<8x128xi32>
    %c8_i32 = arith.constant 8 : i32
    %40 = arith.muli %arg0, %c8_i32 : i32
    %41 = vector.broadcast %40 : i32 to vector<8x128xi32>
    %42 = arith.addi %41, %38 : vector<8x128xi32>
    %c128_i32 = arith.constant 128 : i32
    %43 = vector.broadcast %c128_i32 : i32 to vector<8x128xi32>
    %44 = arith.muli %42, %43 : vector<8x128xi32>
    %45 = arith.addi %44, %39 : vector<8x128xi32>
    %c0_22 = arith.constant 0 : index
    %46 = memref.load %arg1[%c0_22] : memref<1xi32, #tpu.memory_space<smem>>
    %47 = vector.broadcast %46 : i32 to vector<8x128xi32>
    %48 = arith.cmpi slt, %45, %47 : vector<8x128xi32>
    %cst_23 = arith.constant 0.000000e+00 : f32
    %49 = vector.broadcast %cst_23 : f32 to vector<8x128xf32>
    %50 = arith.select %48, %37, %49 : vector<8x128xi1>, vector<8x128xf32>
    %51 = vector.shape_cast %50 : vector<8x128xf32> to vector<1x8x128xf32>
    %cst_24 = arith.constant dense<0.000000e+00> : vector<8x128xf32>
    %52 = vector.multi_reduction <add>, %51, %cst_24 [0] : vector<1x8x128xf32> to vector<8x128xf32>
    %c0_25 = arith.constant 0 : index
    %c0_26 = arith.constant 0 : index
    %c0_27 = arith.constant 0 : index
    %53 = vector.load %arg4[%c0_25, %c0_26, %c0_27] : memref<1x8x128xf32, #tpu.memory_space<vmem>>, vector<1x8x128xf32>
    %54 = vector.shape_cast %53 : vector<1x8x128xf32> to vector<8x128xf32>
    %55 = vector.shape_cast %52 : vector<8x128xf32> to vector<1x8x128xf32>
    tpu.vector_store %arg4[%c0_25, %c0_26, %c0_27], %55 {strides = array<i32>} : memref<1x8x128xf32, #tpu.memory_space<vmem>>, vector<1x8x128xf32>,
    return
  }
  func.func @transform_0(%arg0: i32, %arg1: memref<1xi32, #tpu.memory_space<smem>>) -> (i32, i32, i32) {
    %c0_i32 = arith.constant 0 : i32
    %c0_i32_0 = arith.constant 0 : i32
    %c0_i32_1 = arith.constant 0 : i32
    return %c0_i32, %arg0, %c0_i32_0 : i32, i32, i32
  }
  func.func @transform_1(%arg0: i32, %arg1: memref<1xi32, #tpu.memory_space<smem>>) -> (i32, i32, i32) {
    %c0_i32 = arith.constant 0 : i32
    %c0_i32_0 = arith.constant 0 : i32
    %c0_i32_1 = arith.constant 0 : i32
    return %c0_i32, %arg0, %c0_i32_0 : i32, i32, i32
  }
  func.func @transform_2(%arg0: i32, %arg1: memref<1xi32, #tpu.memory_space<smem>>) -> (i32, i32, i32) {
    %c0_i32 = arith.constant 0 : i32
    %c0_i32_0 = arith.constant 0 : i32
    %c0_i32_1 = arith.constant 0 : i32
    return %arg0, %c0_i32, %c0_i32_0 : i32, i32, i32
  }
}

</mosaic_0001>

<bundles_post_ra>
// kernel: tpu_custom_call.1
= control target key start
LH: loop header
LB: loop body
LE: loop exit
PB: predicated region body
PF: predicated region fallthrough
CT: control target
= control target key end

     0   :  { %9 = vsyncpa [#allocation5], 0  ;;  %s250_s0 = inlined_call_operand.<no memory space> [shape: s32[1], index: 0, kind: input, shape index: {}]   ;;  %s251_s1 = inlined_call_operand.hbm [shape: f32[4,8,128], index: 1, kind: input, shape index: {}]   ;;  %s252_s2 = inlined_call_operand.hbm [shape: f32[4,8,128], index: 2, kind: input, shape index: {}]   ;;  %s253_s3 = inlined_call_operand.hbm [shape: f32[1,8,128], index: 3, kind: output, shape index: {}]  }
   0x1   :  { %10 = vsyncpa [#allocation8], 0 }
   0x2   :  { %11 = vsyncpa [#allocation6], 0  ;;  %s186_s12 = smov [#allocation4]   ;;  %s114_s16 = scalar_lea.hbm %s251_s1, 512 }
   0x3   :  { %s17_s13 = sshll.u32 %s186_s12, 4  ;;  %p115_p0 = scmp.ne.s32.totalorder %s251_s1, %s114_s16  ;;  %s18_s13 = int_to_ptr.vmem [resolvable:$true] %s17_s13 }
   0x4   :  { %p118_p1 = scmp.lt.u32.totalorder %s114_s16, %s251_s1 }
   0x6   :  { %p120_p2 = pnand %p118_p1, %p115_p0 }
   0x8   :  { %123 = shalt.err (!%p120_p2)
}
   0x9   :  { %s124_s21 = scalar_lea.vmem %s18_s13, 512  ;;  %p129_p4 = scmp.lt.s32.totalorder %s18_s13, %s18_s13 }
   0xa   :  { %p125_p3 = scmp.ne.s32.totalorder %s18_s13, %s124_s21  ;;  %p130_p5 = scmp.lt.s32.totalorder %s124_s21, %s124_s21 }
   0xc   :  { %p131_p6 = por %p130_p5, %p129_p4 }
   0xe   :  { %p132_p7 = pnand %p131_p6, %p125_p3 }
  0x10   :  { %135 = shalt.err (!%p132_p7)
}
  0x11   :  { %s187_s22 = smov 128   ;;  %s188_s23 = smov 8  }
  0x12   :  { %23 = dma.hbm_to_vmem [thread:$0]  %s251_s1, 512, %s18_s13, [#allocation5], %s187_s22, %s187_s22, %s188_s23  }
  0x13   :  { %s189_s26 = smov [#allocation7]   ;;  %s136_s30 = scalar_lea.hbm %s252_s2, 512 }
  0x14   :  { %s29_s27 = sshll.u32 %s189_s26, 4  ;;  %p137_p8 = scmp.ne.s32.totalorder %s252_s2, %s136_s30  ;;  %s30_s27 = int_to_ptr.vmem [resolvable:$true] %s29_s27 }
  0x15   :  { %p140_p9 = scmp.lt.u32.totalorder %s136_s30, %s252_s2 }
  0x17   :  { %p142_p10 = pnand %p140_p9, %p137_p8 }
  0x19   :  { %145 = shalt.err (!%p142_p10)
}
  0x1a   :  { %s146_s8 = scalar_lea.vmem %s30_s27, 512  ;;  %p151_p12 = scmp.lt.s32.totalorder %s30_s27, %s30_s27 }
  0x1b   :  { %p147_p11 = scmp.ne.s32.totalorder %s30_s27, %s146_s8  ;;  %p152_p13 = scmp.lt.s32.totalorder %s146_s8, %s146_s8 }
  0x1d   :  { %p153_p0 = por %p152_p13, %p151_p12 }
  0x1f   :  { %p154_p1 = pnand %p153_p0, %p147_p11 }
  0x21   :  { %157 = shalt.err (!%p154_p1)
}
  0x22   :  { %35 = dma.hbm_to_vmem [thread:$0]  %s252_s2, 512, %s30_s27, [#allocation8], %s187_s22, %s187_s22, %s188_s23  }
  0x23   :  { %180 = dma.done.wait [#allocation5], 512  }
  0x24   :  { %181 = vsyncadd [#allocation5], 4294966784 }
  0x25   :  { %182 = dma.done.wait [#allocation8], 512  }
  0x26   :  { %183 = vsyncadd [#allocation8], 4294966784  ;;  %v42_v0 = vld [vmem:[#allocation4] sm:$0xff]  ;;  %v44_v1 = vld [vmem:[#allocation4 + $0x8] sm:$0xff]  ;;  %v76_v23 = vlaneseq  ;;  %v86_v30 = vstv %s250_s0  ;;  %s190_s11 = smov [#allocation9]  }
  0x27   :  { %v46_v2 = vld [vmem:[#allocation4 + $0x10] sm:$0xff]  ;;  %v48_v3 = vld [vmem:[#allocation4 + $0x18] sm:$0xff]  ;;  %v49_v4 = vld [vmem:[#allocation7] sm:$0xff]  ;;  %s97_s12 = sshll.u32 %s190_s11, 4  ;;  %s98_s12 = int_to_ptr.vmem [resolvable:$true] %s97_s12 }
  0x28   :  { %v51_v5 = vld [vmem:[#allocation7 + $0x8] sm:$0xff]  ;;  %v59_v6 = vadd.f32 %v46_v2, %v42_v0  ;;  %v53_v7 = vld [vmem:[#allocation7 + $0x10] sm:$0xff]  ;;  %v55_v8 = vld [vmem:[#allocation7 + $0x18] sm:$0xff]  ;;  %v60_v9 = vadd.f32 %v48_v3, %v44_v1  ;;  %v62_v10 = vmin.f32 %v42_v0, %v49_v4  ;;  %v77_v25 = vshrl.u32 %v76_v23, 7  ;;  %s158_s13 = scalar_lea.vmem %s98_s12, 128  ;;  %p163_p3 = scmp.lt.s32.totalorder %s98_s12, %s98_s12 }
  0x29   :  { %v66_v11 = vmin.f32 %v44_v1, %v51_v5  ;;  %v56_v12 = vadd.f32 %v53_v7, %v49_v4  ;;  %v57_v13 = vadd.f32 %v55_v8, %v51_v5  ;;  %v63_v14 = vmin.f32 %v46_v2, %v53_v7  ;;  %p159_p2 = scmp.ne.s32.totalorder %s98_s12, %s158_s13  ;;  %p164_p4 = scmp.lt.s32.totalorder %s158_s13, %s158_s13 }
  0x2a   :  { %v65_v15 = vmin.f32 %v48_v3, %v55_v8  ;;  %v61_v16 = vmul.f32 %v60_v9, %v59_v6  ;;  %v79_v26 = vand.u32 127, %v76_v23  ;;  %v83_v27 = vmul.u32 128, %v77_v25 }
  0x2b   :  { %v58_v17 = vmul.f32 %v57_v13, %v56_v12  ;;  %v64_v18 = vadd.f32 %v63_v14, %v62_v10  ;;  %p165_p5 = por %p164_p4, %p163_p3 }
  0x2c   :  { %v67_v19 = vadd.f32 %v66_v11, %v65_v15  ;;  %v84_v29 = vadd.s32 %v83_v27, %v79_v26 }
  0x2d   :  { %v69_v21 = vadd.f32 %v61_v16, %v58_v17  ;;  %p166_p6 = pnand %p165_p5, %p159_p2 }
  0x2e   :  { %v68_v20 = vmul.f32 %v67_v19, %v64_v18  ;;  %vm87_vm0 = vcmp.lt.s32.totalorder %v84_v29, %v86_v30 }
  0x30   :  { %v70_v22 = vsub.f32 %v69_v21, %v68_v20  ;;  %v71_v28 = vadd.f32 1.0, %v68_v20 }
  0x32   :  { %v72_v24 = vadd.f32 1.0, %v70_v22 }
  0x34   :  { %112 = vrcp.f32 %v72_v24 }
  0x3e   :  { %v113_v31 = vpop.eup %112 }
  0x3f   :  { %v74_v32 = vmul.f32 %v113_v31, %v71_v28 }
  0x41   :  { %v75_v33 = vsub.f32 1.0, %v74_v32 }
  0x43   :  { %v88_v34 = vsel %vm87_vm0, %v75_v33, 0.0 }
  0x44   :  { %90 = vst [vmem:[#allocation9] sm:$0xff] %v88_v34 }
  0x45   :  { %169 = shalt.err (!%p166_p6)
}
  0x46   :  { %s170_s0 = scalar_lea.hbm %s253_s3, 128 }
  0x47   :  { %p171_p7 = scmp.ne.s32.totalorder %s253_s3, %s170_s0  ;;  %p174_p8 = scmp.lt.u32.totalorder %s170_s0, %s253_s3 }
  0x49   :  { %p176_p9 = pnand %p174_p8, %p171_p7 }
  0x4b   :  { %179 = shalt.err (!%p176_p9)
}
  0x4c   :  { %100 = dma.vmem_to_hbm [thread:$0]  %s98_s12, 128, %s253_s3, [#allocation6]  }
  0x4d   :  { %184 = dma.done.wait [#allocation6], 128  }
  0x4e   :  { %185 = vsyncadd [#allocation6], 4294967168 }
  0x4f   :  { %104 = vsyncpa [#allocation5], 1 }
  0x50   :  { %105 = vsyncpa [#allocation8], 1 }
  0x51   :  { %106 = vsyncpa [#allocation6], 1 }

</bundles_post_ra>
